<compile_context>
chip_gen: v7x
topology: tpu7x:2x2x1
jax: 0.10.0
libtpu: 0.0.40
codegen_flags: <defaults>
</compile_context>

<pallas_src>
import functools

import jax
import jax.numpy as jnp
from jax.experimental import pallas as pl
from jax.experimental.pallas import tpu as pltpu

_LANE = 128


def _scale_kernel(param_ref, x_ref, o_ref):
    # param_ref: (1,) scalar in SMEM; x_ref / o_ref: VMEM tiles.
    o_ref[...] = (x_ref[...] * param_ref[0]).astype(o_ref.dtype)


def _sublane_for_dtype(dtype) -> int:
    return {4: 8, 2: 16, 1: 32}.get(jnp.dtype(dtype).itemsize, 8)


def _round_up(x: int, m: int) -> int:
    return ((x + m - 1) // m) * m


@functools.lru_cache(maxsize=1)
def _tpu_generation() -> str:
    try:
        kind = (jax.devices()[0].device_kind or "").lower()
    except Exception:
        return "other"
    if "v5 lite" in kind or "v5e" in kind or "v5lite" in kind:
        return "v5e"
    if "v6" in kind:
        return "v6e"
    if "v7" in kind or "7x" in kind:
        return "v7x"
    return "other"


def _tile_policy(gen: str):
    """Returns (max_tile_bytes, force_split_above_bytes_or_None)."""
    if gen == "v7x":
        return 4 << 20, 2 << 20   # big tiles + keep both TensorCores busy
    if gen == "v6e":
        return 4 << 20, None      # 4 x 4 MiB buffers < 32 MiB default scoped VMEM
    if gen == "v5e":
        return 1 << 20, None      # already on the HBM roofline plateau
    return 2 << 20, None


def simple_test_model_forward(x, param, *, max_tile_bytes=None,
                              min_pallas_bytes: int = 256 * 1024):
    """y = x * param  (param has shape (1,), broadcast over all of x)."""
    orig_shape = x.shape
    n_elems = x.size
    itemsize = jnp.dtype(x.dtype).itemsize

    # Tiny inputs: pallas_call dispatch / DMA issue dominate; fused XLA mul wins.
    if n_elems == 0 or n_elems * itemsize < min_pallas_bytes:
        return (x * param).astype(x.dtype)

    gen = _tpu_generation()
    policy_tile_bytes, split_above = _tile_policy(gen)
    if max_tile_bytes is None:
        max_tile_bytes = policy_tile_bytes

    sublane = _sublane_for_dtype(x.dtype)
    cap_rows = max(sublane,
                   (max_tile_bytes // (_LANE * itemsize)) // sublane * sublane)

    # Lane-dense slab: rows x 128. Pad only the tail (< 128 elements) needed for
    # the reshape; no whole-array pad / slice for 128-divisible element counts.
    rows = pl.cdiv(n_elems, _LANE)
    padded = rows * _LANE
    x_flat = x.reshape(-1)
    if padded != n_elems:
        x_flat = jnp.pad(x_flat, (0, padded - n_elems))
    x2d = x_flat.reshape(rows, _LANE)

    slab_bytes = padded * itemsize
    n_tiles = pl.cdiv(rows, cap_rows)
    if split_above is not None and n_tiles == 1 and slab_bytes > split_above:
        n_tiles = 2  # v7x: let both TensorCores stream

    if n_tiles == 1:
        # Single block == full array dims (always legal), zero per-step overhead.
        tile_rows = rows
    else:
        # Balanced tiles; block shape stays a multiple of (sublane, 128), so the
        # ragged last block is legal and its overhang is masked on store.
        tile_rows = min(cap_rows, _round_up(pl.cdiv(rows, n_tiles), sublane))
    grid = (pl.cdiv(rows, tile_rows),)

    out2d = pl.pallas_call(
        _scale_kernel,
        out_shape=jax.ShapeDtypeStruct((rows, _LANE), x.dtype),
        grid_spec=pl.GridSpec(
            grid=grid,
            in_specs=[
                pl.BlockSpec(memory_space=pltpu.SMEM),               # param (1,)
                pl.BlockSpec((tile_rows, _LANE), lambda i: (i, 0)),  # x tile
            ],
            out_specs=pl.BlockSpec((tile_rows, _LANE), lambda i: (i, 0)),
        ),
        compiler_params=pltpu.CompilerParams(
            dimension_semantics=("parallel",),
        ),
        cost_estimate=pl.CostEstimate(
            flops=n_elems,
            transcendentals=0,
            bytes_accessed=2 * padded * itemsize + param.size * param.dtype.itemsize,
        ),
    )(param, x2d)

    out_flat = out2d.reshape(-1)
    if padded != n_elems:
        out_flat = out_flat[:n_elems]
    return out_flat.reshape(orig_shape)


if __name__ == "__main__":
    key = jax.random.PRNGKey(0)
    kx, kp = jax.random.split(key)

    # Shapes consistent with the module: batch=2, channels=4, spatial=16.
    x = jax.random.normal(kx, (2, 4, 16, 16), dtype=jnp.float32)
    # Learned scalar parameter (matches nn.Parameter(torch.randn(1))).
    param = jax.random.normal(kp, (1,), dtype=jnp.float32)
    y_ref = x * param

    # 1) Default path: tiny input takes the fused-XLA bypass.
    y = jax.block_until_ready(simple_test_model_forward(x, param))
    assert y.shape == x.shape and y.dtype == x.dtype
    assert jnp.allclose(y, y_ref, atol=1e-6, rtol=1e-6)

    # 2) Forced Pallas path on the same input (single full-array block).
    y_k = jax.block_until_ready(
        simple_test_model_forward(x, param, min_pallas_bytes=0))
    assert y_k.shape == x.shape and y_k.dtype == x.dtype
    assert jnp.allclose(y_k, y_ref, atol=1e-6, rtol=1e-6)

    # 3) Multi-tile path: non-128-divisible element count and a ragged last
    #    block (small tile cap keeps the run quick).
    x_big = jax.random.normal(kx, (3, 5, 37, 41), dtype=jnp.float32)
    y_big = jax.block_until_ready(
        simple_test_model_forward(x_big, param,
                                  max_tile_bytes=64 * 1024, min_pallas_bytes=0))
    assert jnp.allclose(y_big, x_big * param, atol=1e-6, rtol=1e-6)

    print("KERNEL_OK")
</pallas_src>

<mosaic_0001>
module attributes {stable_mosaic.version = 11 : i64} {
  func.func @_scale_kernel(%arg0: i32, %arg1: memref<1xf32, #tpu.memory_space<smem>>, %arg2: memref<16x128xf32, #tpu.memory_space<vmem>>, %arg3: memref<16x128xf32, #tpu.memory_space<vmem>>) attributes {dimension_semantics = [#tpu.dimension_semantics<parallel>], iteration_bounds = array<i64: 1>, scalar_prefetch = 0 : i64, scratch_operands = 0 : i64, tpu.core_type = #tpu.core_type<tc>, window_params = [{transform_indices = @transform_0, window_bounds = array<i64: 1>}, {transform_indices = @transform_1, window_bounds = array<i64: 16, 128>}, {transform_indices = @transform_2, window_bounds = array<i64: 16, 128>}]} {
    %c0 = arith.constant 0 : index
    %c0_0 = arith.constant 0 : index
    %0 = vector.load %arg2[%c0, %c0_0] : memref<16x128xf32, #tpu.memory_space<vmem>>, vector<16x128xf32>
    %c0_1 = arith.constant 0 : index
    %1 = memref.load %arg1[%c0_1] : memref<1xf32, #tpu.memory_space<smem>>
    %2 = vector.broadcast %1 : f32 to vector<16x128xf32>
    %3 = arith.mulf %0, %2 : vector<16x128xf32>
    %c0_2 = arith.constant 0 : index
    %c0_3 = arith.constant 0 : index
    %4 = vector.load %arg3[%c0_2, %c0_3] : memref<16x128xf32, #tpu.memory_space<vmem>>, vector<16x128xf32>
    tpu.vector_store %arg3[%c0_2, %c0_3], %3 {strides = array<i32>} : memref<16x128xf32, #tpu.memory_space<vmem>>, vector<16x128xf32>,
    return
  }
  func.func @transform_0(%arg0: i32) -> i32 {
    %c0_i32 = arith.constant 0 : i32
    %c0_i32_0 = arith.constant 0 : i32
    return %c0_i32 : i32
  }
  func.func @transform_1(%arg0: i32) -> (i32, i32) {
    %c0_i32 = arith.constant 0 : i32
    %c0_i32_0 = arith.constant 0 : i32
    return %arg0, %c0_i32 : i32, i32
  }
  func.func @transform_2(%arg0: i32) -> (i32, i32) {
    %c0_i32 = arith.constant 0 : i32
    %c0_i32_0 = arith.constant 0 : i32
    return %arg0, %c0_i32 : i32, i32
  }
}

</mosaic_0001>

<bundles_post_ra>
// kernel: tpu_custom_call.1
= control target key start
LH: loop header
LB: loop body
LE: loop exit
PB: predicated region body
PF: predicated region fallthrough
CT: control target
= control target key end

     0   :  { %8 = vsyncpa [#allocation4], 0  ;;  %s156_s0 = inlined_call_operand.<no memory space> [shape: f32[1], index: 0, kind: input, shape index: {}]   ;;  %s157_s1 = inlined_call_operand.hbm [shape: f32[16,128], index: 1, kind: input, shape index: {}]   ;;  %s158_s2 = inlined_call_operand.hbm [shape: f32[16,128], index: 2, kind: output, shape index: {}]  }
   0x1   :  { %9 = vsyncpa [#allocation5], 0  ;;  %s104_s9 = smov [#allocation3]   ;;  %s56_s13 = scalar_lea.hbm %s157_s1, 256 }
   0x2   :  { %s17_s10 = sshll.u32 %s104_s9, 4  ;;  %p57_p0 = scmp.ne.s32.totalorder %s157_s1, %s56_s13  ;;  %s18_s10 = int_to_ptr.vmem [resolvable:$true] %s17_s10 }
   0x3   :  { %p60_p1 = scmp.lt.u32.totalorder %s56_s13, %s157_s1 }
   0x5   :  { %p62_p2 = pnand %p60_p1, %p57_p0 }
   0x7   :  { %65 = shalt.err (!%p62_p2)
}
   0x8   :  { %s66_s18 = scalar_lea.vmem %s18_s10, 256  ;;  %p71_p4 = scmp.lt.s32.totalorder %s18_s10, %s18_s10 }
   0x9   :  { %p67_p3 = scmp.ne.s32.totalorder %s18_s10, %s66_s18  ;;  %p72_p5 = scmp.lt.s32.totalorder %s66_s18, %s66_s18 }
   0xb   :  { %p73_p6 = por %p72_p5, %p71_p4 }
   0xd   :  { %p74_p7 = pnand %p73_p6, %p67_p3 }
   0xf   :  { %77 = shalt.err (!%p74_p7)
}
  0x10   :  { %s105_s19 = smov 128   ;;  %s106_s20 = smov 8  }
  0x11   :  { %23 = dma.hbm_to_vmem [thread:$0]  %s157_s1, 256, %s18_s10, [#allocation4], %s105_s19, %s105_s19, %s106_s20  }
  0x12   :  { %100 = dma.done.wait [#allocation4], 256  }
  0x13   :  { %101 = vsyncadd [#allocation4], 4294967040  ;;  %v30_v0 = vstv %s156_s0  ;;  %s107_s25 = smov [#allocation6]   ;;  %v27_v1 = vld [vmem:[#allocation3] sm:$0xff]  ;;  %v28_v2 = vld [vmem:[#allocation3 + $0x8] sm:$0xff] }
  0x14   :  { %s40_s26 = sshll.u32 %s107_s25, 4  ;;  %v31_v3 = vmul.f32 %v30_v0, %v27_v1  ;;  %v32_v4 = vmul.f32 %v30_v0, %v28_v2  ;;  %s41_s26 = int_to_ptr.vmem [resolvable:$true] %s40_s26 }
  0x15   :  { %s78_s27 = scalar_lea.vmem %s41_s26, 256  ;;  %p83_p9 = scmp.lt.s32.totalorder %s41_s26, %s41_s26 }
  0x16   :  { %33 = vst [vmem:[#allocation6] sm:$0xff] %v31_v3  ;;  %34 = vst [vmem:[#allocation6 + $0x8] sm:$0xff] %v32_v4  ;;  %p79_p8 = scmp.ne.s32.totalorder %s41_s26, %s78_s27  ;;  %p84_p10 = scmp.lt.s32.totalorder %s78_s27, %s78_s27 }
  0x18   :  { %p85_p11 = por %p84_p10, %p83_p9 }
  0x1a   :  { %p86_p12 = pnand %p85_p11, %p79_p8 }
  0x1c   :  { %89 = shalt.err (!%p86_p12)
}
  0x1d   :  { %s90_s0 = scalar_lea.hbm %s158_s2, 256 }
  0x1e   :  { %p91_p13 = scmp.ne.s32.totalorder %s158_s2, %s90_s0  ;;  %p94_p0 = scmp.lt.u32.totalorder %s90_s0, %s158_s2 }
  0x20   :  { %p96_p1 = pnand %p94_p0, %p91_p13 }
  0x22   :  { %99 = shalt.err (!%p96_p1)
}
  0x23   :  { %46 = dma.vmem_to_hbm [thread:$0]  %s41_s26, 256, %s158_s2, [#allocation5], %s105_s19, %s105_s19, %s106_s20  }
  0x24   :  { %102 = dma.done.wait [#allocation5], 256  }
  0x25   :  { %103 = vsyncadd [#allocation5], 4294967040 }
  0x26   :  { %50 = vsyncpa [#allocation4], 1 }
  0x27   :  { %51 = vsyncpa [#allocation5], 1 }

</bundles_post_ra>
